<compile_context>
chip_gen: v7x
topology: tpu7x:2x2x1
jax: 0.10.0
libtpu: 0.0.40
codegen_flags: <defaults>
</compile_context>

<pallas_src>
import functools

import jax
import jax.numpy as jnp
from jax.experimental import pallas as pl
from jax.experimental.pallas import tpu as pltpu


_GROUP = 16          # batch rows packed per 128-lane slab (16 rows * 8 features)
_IN_FEATS = 8
_HID = 16


def _round_up(n, m):
    return -(-n // m) * m


def _autoencoder_kernel(x_ref, w1_ref, b1_ref, w23_ref, b23_ref, w4_ref, b4_ref,
                        out_ref):
    # x: (tb, 128) f32 = tb*16 packed batch rows; weights are bf16 block-diag
    # packed; biases are f32.  bf16 MXU inputs, f32 accumulation throughout.
    x = x_ref[...].astype(jnp.bfloat16)

    h = jnp.dot(x, w1_ref[...], preferred_element_type=jnp.float32) + b1_ref[...]
    h = jnp.maximum(h, 0.0).astype(jnp.bfloat16)          # encoder ReLU

    h2 = jnp.dot(h, w23_ref[...], preferred_element_type=jnp.float32) + b23_ref[...]
    h2 = jnp.maximum(h2, 0.0).astype(jnp.bfloat16)        # decoder ReLU (folded 16x16 pair)

    out = jnp.dot(h2, w4_ref[...], preferred_element_type=jnp.float32) + b4_ref[...]
    out_ref[...] = out.astype(out_ref.dtype)


def pack_params(params):
    """One-time fold + block-diagonal packing of the Linear weights.

    Weights are stored bf16 (MXU inputs); biases stay f32 (added to the f32
    accumulator).  Call once at init, not per forward.
    """
    w23 = params["w2"] @ params["w3"]                      # (16,16)  fold
    b23 = params["b2"] @ params["w3"] + params["b3"]       # (1,16)

    eye = jnp.eye(_GROUP, dtype=jnp.float32)
    return {
        "w1": jnp.kron(eye, params["w1"]).astype(jnp.bfloat16),    # (128, 256)
        "w23": jnp.kron(eye, w23).astype(jnp.bfloat16),            # (256, 256)
        "w4": jnp.kron(eye, params["w4"]).astype(jnp.bfloat16),    # (256, 128)
        "b1": jnp.tile(params["b1"], (1, _GROUP)).astype(jnp.float32),   # (1, 256)
        "b23": jnp.tile(b23, (1, _GROUP)).astype(jnp.float32),           # (1, 256)
        "b4": jnp.tile(params["b4"], (1, _GROUP)).astype(jnp.float32),   # (1, 128)
    }


@functools.partial(jax.jit, static_argnames=("tile_rows",))
def autoencoder_forward(x, packed, *, tile_rows=2048):
    """x: [B, 8] float32.  packed: output of pack_params()."""
    B, F = x.shape
    assert F == _IN_FEATS
    G = _GROUP

    rows = -(-B // G)                                     # packed rows (16 batch rows each)

    # Grid-step count: enough steps to respect tile_rows, and >=2 balanced
    # steps when there is enough work so v7x's second TensorCore is used.
    nsteps = max(1, -(-rows // tile_rows))
    if rows >= 16:
        nsteps = max(nsteps, 2)
    tb = -(-rows // nsteps)
    if nsteps > 1:
        tb = _round_up(tb, 8)                             # sublane-aligned multi-step blocks
    grid = -(-rows // tb)
    rows_pad = grid * tb
    b_pad = rows_pad * G

    # Only pad the ragged tail; when B tiles cleanly the reshape is a free view.
    if b_pad != B:
        x = jnp.pad(x, ((0, b_pad - B), (0, 0)))
    x_packed = x.reshape(rows_pad, G * F)                 # lane-dense (rows, 128) slab

    def const_spec(a):
        # Constant index_map -> weights/biases stay VMEM-resident across steps.
        return pl.BlockSpec(a.shape, lambda i: (0,) * a.ndim)

    out_packed = pl.pallas_call(
        _autoencoder_kernel,
        out_shape=jax.ShapeDtypeStruct((rows_pad, G * F), jnp.float32),
        grid=(grid,),
        in_specs=[
            pl.BlockSpec((tb, G * F), lambda i: (i, 0)),  # x stream (double-buffered)
            const_spec(packed["w1"]), const_spec(packed["b1"]),
            const_spec(packed["w23"]), const_spec(packed["b23"]),
            const_spec(packed["w4"]), const_spec(packed["b4"]),
        ],
        out_specs=pl.BlockSpec((tb, G * F), lambda i: (i, 0)),
        compiler_params=pltpu.CompilerParams(
            dimension_semantics=("parallel",),            # megacore sharding on v7x
            vmem_limit_bytes=32 * 1024 * 1024),           # tb=2048 tiles ~12-13 MiB
    )(x_packed, packed["w1"], packed["b1"], packed["w23"], packed["b23"],
      packed["w4"], packed["b4"])

    return out_packed.reshape(b_pad, F)[:B]


def init_params(key):
    """Deterministic init matching PyTorch Linear shapes.

    PyTorch stores weight as [out, in]; we store the transpose [in, out] so the
    kernel can do x @ W directly.  Biases are (1, out) for clean broadcast.
    """
    ks = jax.random.split(key, 8)

    def linear(kw, kb, fan_in, fan_out):
        bound = 1.0 / jnp.sqrt(fan_in)
        w = jax.random.uniform(kw, (fan_in, fan_out), jnp.float32, -bound, bound)
        b = jax.random.uniform(kb, (1, fan_out), jnp.float32, -bound, bound)
        return w, b

    w1, b1 = linear(ks[0], ks[1], _IN_FEATS, _HID)
    w2, b2 = linear(ks[2], ks[3], _HID, _HID)
    w3, b3 = linear(ks[4], ks[5], _HID, _HID)
    w4, b4 = linear(ks[6], ks[7], _HID, _IN_FEATS)
    return {"w1": w1, "b1": b1, "w2": w2, "b2": b2,
            "w3": w3, "b3": b3, "w4": w4, "b4": b4}


def reference_forward(x, p):
    """Pure-JAX reference with the ORIGINAL (unfolded) layer structure, f32."""
    h = jnp.maximum(x @ p["w1"] + p["b1"], 0.0)
    enc = h @ p["w2"] + p["b2"]
    h2 = jnp.maximum(enc @ p["w3"] + p["b3"], 0.0)
    return h2 @ p["w4"] + p["b4"]


if __name__ == "__main__":
    key = jax.random.PRNGKey(0)
    k_param, k_x, k_x2 = jax.random.split(key, 3)
    params = init_params(k_param)
    packed = pack_params(params)   # one-time fold + pack (hoisted out of forward)

    # Small demo batch (single grid step, tail padding path).
    batch = 8
    x = jax.random.normal(k_x, (batch, _IN_FEATS), dtype=jnp.float32)
    out = jax.block_until_ready(autoencoder_forward(x, packed))
    ref = reference_forward(x, params)
    assert out.shape == (batch, _IN_FEATS)
    # bf16 MXU inputs with f32 accumulation + folded w2@w3 => ~1e-3-level abs
    # error vs the f32 reference; tolerance chosen accordingly (documented).
    err = float(jnp.max(jnp.abs(out - ref)))
    assert jnp.allclose(out, ref, atol=3e-2, rtol=3e-2), err

    # Larger batch: exercises the multi-step "parallel" grid (2 steps, no pad)
    # and validates the bf16 tolerance away from the toy shape.
    batch2 = 4096
    x2 = jax.random.normal(k_x2, (batch2, _IN_FEATS), dtype=jnp.float32)
    out2 = jax.block_until_ready(autoencoder_forward(x2, packed))
    ref2 = reference_forward(x2, params)
    assert out2.shape == (batch2, _IN_FEATS)
    err2 = float(jnp.max(jnp.abs(out2 - ref2)))
    assert jnp.allclose(out2, ref2, atol=3e-2, rtol=3e-2), err2

    print("KERNEL_OK")
</pallas_src>

<mosaic_0001>
module attributes {stable_mosaic.version = 11 : i64} {
  func.func @_autoencoder_kernel(%arg0: i32, %arg1: memref<1x128xf32, #tpu.memory_space<vmem>>, %arg2: memref<128x256xbf16, #tpu.memory_space<vmem>>, %arg3: memref<1x256xf32, #tpu.memory_space<vmem>>, %arg4: memref<256x256xbf16, #tpu.memory_space<vmem>>, %arg5: memref<1x256xf32, #tpu.memory_space<vmem>>, %arg6: memref<256x128xbf16, #tpu.memory_space<vmem>>, %arg7: memref<1x128xf32, #tpu.memory_space<vmem>>, %arg8: memref<1x128xf32, #tpu.memory_space<vmem>>) attributes {dimension_semantics = [#tpu.dimension_semantics<parallel>], iteration_bounds = array<i64: 1>, scalar_prefetch = 0 : i64, scratch_operands = 0 : i64, tpu.core_type = #tpu.core_type<tc>, window_params = [{transform_indices = @transform_0, window_bounds = array<i64: 1, 128>}, {pipeline_mode = #tpu.pipeline_mode<synchronous>, transform_indices = @transform_1, window_bounds = array<i64: 128, 256>}, {pipeline_mode = #tpu.pipeline_mode<synchronous>, transform_indices = @transform_2, window_bounds = array<i64: 1, 256>}, {pipeline_mode = #tpu.pipeline_mode<synchronous>, transform_indices = @transform_3, window_bounds = array<i64: 256, 256>}, {pipeline_mode = #tpu.pipeline_mode<synchronous>, transform_indices = @transform_4, window_bounds = array<i64: 1, 256>}, {pipeline_mode = #tpu.pipeline_mode<synchronous>, transform_indices = @transform_5, window_bounds = array<i64: 256, 128>}, {pipeline_mode = #tpu.pipeline_mode<synchronous>, transform_indices = @transform_6, window_bounds = array<i64: 1, 128>}, {transform_indices = @transform_7, window_bounds = array<i64: 1, 128>}]} {
    %c0 = arith.constant 0 : index
    %c0_0 = arith.constant 0 : index
    %0 = vector.load %arg1[%c0, %c0_0] : memref<1x128xf32, #tpu.memory_space<vmem>>, vector<1x128xf32>
    %1 = arith.truncf %0 : vector<1x128xf32> to vector<1x128xbf16>
    %c0_1 = arith.constant 0 : index
    %c0_2 = arith.constant 0 : index
    %2 = vector.load %arg2[%c0_1, %c0_2] : memref<128x256xbf16, #tpu.memory_space<vmem>>, vector<128x256xbf16>
    %cst = arith.constant dense<0.000000e+00> : vector<1x256xf32>
    %3 = tpu.matmul %1, %2, %cst {dimension_numbers = #tpu.dot_dimension_numbers<[1], [0], [0], [1], [0, 0, 1, 1], [], []>} : vector<1x128xbf16>, vector<128x256xbf16>, vector<1x256xf32> -> vector<1x256xf32>
    %c0_3 = arith.constant 0 : index
    %c0_4 = arith.constant 0 : index
    %4 = vector.load %arg3[%c0_3, %c0_4] : memref<1x256xf32, #tpu.memory_space<vmem>>, vector<1x256xf32>
    %5 = arith.addf %3, %4 : vector<1x256xf32>
    %cst_5 = arith.constant 0.000000e+00 : f32
    %6 = vector.broadcast %cst_5 : f32 to vector<1x256xf32>
    %7 = arith.maximumf %5, %6 : vector<1x256xf32>
    %8 = arith.truncf %7 : vector<1x256xf32> to vector<1x256xbf16>
    %c0_6 = arith.constant 0 : index
    %c0_7 = arith.constant 0 : index
    %9 = vector.load %arg4[%c0_6, %c0_7] : memref<256x256xbf16, #tpu.memory_space<vmem>>, vector<256x256xbf16>
    %cst_8 = arith.constant dense<0.000000e+00> : vector<1x256xf32>
    %10 = tpu.matmul %8, %9, %cst_8 {dimension_numbers = #tpu.dot_dimension_numbers<[1], [0], [0], [1], [0, 0, 1, 1], [], []>} : vector<1x256xbf16>, vector<256x256xbf16>, vector<1x256xf32> -> vector<1x256xf32>
    %c0_9 = arith.constant 0 : index
    %c0_10 = arith.constant 0 : index
    %11 = vector.load %arg5[%c0_9, %c0_10] : memref<1x256xf32, #tpu.memory_space<vmem>>, vector<1x256xf32>
    %12 = arith.addf %10, %11 : vector<1x256xf32>
    %cst_11 = arith.constant 0.000000e+00 : f32
    %13 = vector.broadcast %cst_11 : f32 to vector<1x256xf32>
    %14 = arith.maximumf %12, %13 : vector<1x256xf32>
    %15 = arith.truncf %14 : vector<1x256xf32> to vector<1x256xbf16>
    %c0_12 = arith.constant 0 : index
    %c0_13 = arith.constant 0 : index
    %16 = vector.load %arg6[%c0_12, %c0_13] : memref<256x128xbf16, #tpu.memory_space<vmem>>, vector<256x128xbf16>
    %cst_14 = arith.constant dense<0.000000e+00> : vector<1x128xf32>
    %17 = tpu.matmul %15, %16, %cst_14 {dimension_numbers = #tpu.dot_dimension_numbers<[1], [0], [0], [1], [0, 0, 1, 1], [], []>} : vector<1x256xbf16>, vector<256x128xbf16>, vector<1x128xf32> -> vector<1x128xf32>
    %c0_15 = arith.constant 0 : index
    %c0_16 = arith.constant 0 : index
    %18 = vector.load %arg7[%c0_15, %c0_16] : memref<1x128xf32, #tpu.memory_space<vmem>>, vector<1x128xf32>
    %19 = arith.addf %17, %18 : vector<1x128xf32>
    %c0_17 = arith.constant 0 : index
    %c0_18 = arith.constant 0 : index
    %20 = vector.load %arg8[%c0_17, %c0_18] : memref<1x128xf32, #tpu.memory_space<vmem>>, vector<1x128xf32>
    tpu.vector_store %arg8[%c0_17, %c0_18], %19 {strides = array<i32>} : memref<1x128xf32, #tpu.memory_space<vmem>>, vector<1x128xf32>,
    return
  }
  func.func @transform_0(%arg0: i32) -> (i32, i32) {
    %c0_i32 = arith.constant 0 : i32
    %c0_i32_0 = arith.constant 0 : i32
    return %arg0, %c0_i32 : i32, i32
  }
  func.func @transform_1(%arg0: i32) -> (i32, i32) {
    %c0_i32 = arith.constant 0 : i32
    %c0_i32_0 = arith.constant 0 : i32
    %c0_i32_1 = arith.constant 0 : i32
    return %c0_i32, %c0_i32_0 : i32, i32
  }
  func.func @transform_2(%arg0: i32) -> (i32, i32) {
    %c0_i32 = arith.constant 0 : i32
    %c0_i32_0 = arith.constant 0 : i32
    %c0_i32_1 = arith.constant 0 : i32
    return %c0_i32, %c0_i32_0 : i32, i32
  }
  func.func @transform_3(%arg0: i32) -> (i32, i32) {
    %c0_i32 = arith.constant 0 : i32
    %c0_i32_0 = arith.constant 0 : i32
    %c0_i32_1 = arith.constant 0 : i32
    return %c0_i32, %c0_i32_0 : i32, i32
  }
  func.func @transform_4(%arg0: i32) -> (i32, i32) {
    %c0_i32 = arith.constant 0 : i32
    %c0_i32_0 = arith.constant 0 : i32
    %c0_i32_1 = arith.constant 0 : i32
    return %c0_i32, %c0_i32_0 : i32, i32
  }
  func.func @transform_5(%arg0: i32) -> (i32, i32) {
    %c0_i32 = arith.constant 0 : i32
    %c0_i32_0 = arith.constant 0 : i32
    %c0_i32_1 = arith.constant 0 : i32
    return %c0_i32, %c0_i32_0 : i32, i32
  }
  func.func @transform_6(%arg0: i32) -> (i32, i32) {
    %c0_i32 = arith.constant 0 : i32
    %c0_i32_0 = arith.constant 0 : i32
    %c0_i32_1 = arith.constant 0 : i32
    return %c0_i32, %c0_i32_0 : i32, i32
  }
  func.func @transform_7(%arg0: i32) -> (i32, i32) {
    %c0_i32 = arith.constant 0 : i32
    %c0_i32_0 = arith.constant 0 : i32
    return %arg0, %c0_i32 : i32, i32
  }
}

</mosaic_0001>

<bundles_post_ra>
// kernel: autoencoder_forward.1
= control target key start
LH: loop header
LB: loop body
LE: loop exit
PB: predicated region body
PF: predicated region fallthrough
CT: control target
= control target key end

     0   :  { %12 = vsyncpa [#allocation3], 0  ;;  %s1006_s0 = inlined_call_operand.vmem [shape: f32[1,128], index: 0, kind: input, shape index: {}]   ;;  %s1007_s1 = inlined_call_operand.hbm [shape: bf16[128,256], index: 1, kind: input, shape index: {}]   ;;  %s1008_s2 = inlined_call_operand.vmem [shape: f32[1,256], index: 2, kind: input, shape index: {}]   ;;  %s1009_s3 = inlined_call_operand.hbm [shape: bf16[256,256], index: 3, kind: input, shape index: {}]   ;;  %s1010_s4 = inlined_call_operand.vmem [shape: f32[1,256], index: 4, kind: input, shape index: {}]   ;;  %s1011_s5 = inlined_call_operand.hbm [shape: bf16[256,128], index: 5, kind: input, shape index: {}]   ;;  %s1012_s6 = inlined_call_operand.vmem [shape: f32[1,128], index: 6, kind: input, shape index: {}]   ;;  %s1013_s7 = inlined_call_operand.vmem [shape: f32[1,128], index: 7, kind: output, shape index: {}]  }
   0x1   :  { %13 = vsyncpa [#allocation5], 0  ;;  %s900_s24 = smov [#allocation4]   ;;  %s901_s26 = smov [#allocation2]  }
   0x2   :  { %s35_s25 = sshll.u32 %s900_s24, 4  ;;  %s21_s27 = sshll.u32 %s901_s26, 4  ;;  %s36_s25 = int_to_ptr.vmem [resolvable:$true] %s35_s25  ;;  %s948_s27 = int_to_ptr.vmem [resolvable:$true] %s21_s27 }
   0x3   :  { %s830_s30 = scalar_lea.hbm %s1009_s3, 4096 }
   0x4   :  { %p831_p0 = scmp.ne.s32.totalorder %s1009_s3, %s830_s30  ;;  %p834_p1 = scmp.lt.u32.totalorder %s830_s30, %s1009_s3 }
   0x6   :  { %p836_p2 = pnand %p834_p1, %p831_p0 }
   0x8   :  { %839 = shalt.err (!%p836_p2)
}
   0x9   :  { %s840_s12 = scalar_lea.vmem %s36_s25, 4096  ;;  %p845_p4 = scmp.lt.s32.totalorder %s36_s25, %s36_s25 }
   0xa   :  { %p841_p3 = scmp.ne.s32.totalorder %s36_s25, %s840_s12  ;;  %p846_p5 = scmp.lt.s32.totalorder %s840_s12, %s840_s12 }
   0xc   :  { %p847_p6 = por %p846_p5, %p845_p4 }
   0xe   :  { %p848_p7 = pnand %p847_p6, %p841_p3 }
  0x10   :  { %851 = shalt.err (!%p848_p7)
}
  0x11   :  { %s902_s13 = smov 128   ;;  %s903_s14 = smov 8  }
  0x12   :  { %41 = dma.hbm_to_vmem [thread:$0]  %s1009_s3, 4096, %s36_s25, [#allocation5], %s902_s13, %s902_s13, %s903_s14  }
  0x13   :  { %s852_s19 = scalar_lea.hbm %s1007_s1, 2048 }
  0x14   :  { %p853_p8 = scmp.ne.s32.totalorder %s1007_s1, %s852_s19  ;;  %p856_p9 = scmp.lt.u32.totalorder %s852_s19, %s1007_s1 }
  0x16   :  { %p858_p10 = pnand %p856_p9, %p853_p8 }
  0x18   :  { %861 = shalt.err (!%p858_p10)
}
  0x19   :  { %s862_s24 = scalar_lea.vmem %s948_s27, 2048  ;;  %p867_p12 = scmp.lt.s32.totalorder %s948_s27, %s948_s27 }
  0x1a   :  { %p863_p11 = scmp.ne.s32.totalorder %s948_s27, %s862_s24  ;;  %p868_p13 = scmp.lt.s32.totalorder %s862_s24, %s862_s24 }
  0x1c   :  { %p869_p0 = por %p868_p13, %p867_p12 }
  0x1e   :  { %p870_p1 = pnand %p869_p0, %p863_p11 }
  0x20   :  { %873 = shalt.err (!%p870_p1)
}
  0x21   :  { %27 = dma.hbm_to_vmem [thread:$0]  %s1007_s1, 2048, %s948_s27, [#allocation3], %s902_s13, %s902_s13, %s903_s14  }
  0x22   :  { %s904_s26 = smov [#allocation6]   ;;  %s874_s8 = scalar_lea.hbm %s1011_s5, 2048 }
  0x23   :  { %s49_s28 = sshll.u32 %s904_s26, 4  ;;  %p875_p2 = scmp.ne.s32.totalorder %s1011_s5, %s874_s8  ;;  %s50_s28 = int_to_ptr.vmem [resolvable:$true] %s49_s28 }
  0x24   :  { %p878_p3 = scmp.lt.u32.totalorder %s874_s8, %s1011_s5 }
  0x26   :  { %p880_p4 = pnand %p878_p3, %p875_p2 }
  0x28   :  { %883 = shalt.err (!%p880_p4)
}
  0x29   :  { %s884_s15 = scalar_lea.vmem %s50_s28, 2048  ;;  %p889_p6 = scmp.lt.s32.totalorder %s50_s28, %s50_s28 }
  0x2a   :  { %p885_p5 = scmp.ne.s32.totalorder %s50_s28, %s884_s15  ;;  %p890_p7 = scmp.lt.s32.totalorder %s884_s15, %s884_s15 }
  0x2c   :  { %p891_p8 = por %p890_p7, %p889_p6 }
  0x2e   :  { %p892_p9 = pnand %p891_p8, %p885_p5 }
  0x30   :  { %895 = shalt.err (!%p892_p9)
}
  0x31   :  { %s905_s1 = smov 64   ;;  %s906_s27 = smov 4  }
  0x32   :  { %55 = dma.hbm_to_vmem [thread:$0]  %s1011_s5, 2048, %s50_s28, [#allocation5], %s905_s1, %s905_s1, %s906_s27  }
  0x33   :  { %896 = dma.done.wait [#allocation3], 2048  }
  0x34   :  { %897 = vsyncadd [#allocation3], 4294965248 }
  0x35   :  { %898 = dma.done.wait [#allocation5], 6144  }
  0x36   :  { %899 = vsyncadd [#allocation5], 4294961152  ;;  %v907_v0 = vmov 0   ;;  %v742_v1 = vld [vmem:[#allocation2 + $0x4] ss:$8 sps:$4 sm:$0xff]   ;;  %v818_v55 = vld [vmem:[#allocation6 + $0x50] sm:$0xff]   ;;  %v168_v63 = vlaneseq }
  0x37   :  { %210 = vmatprep.mubr.bf16.mxu0 %v907_v0  ;;  %v744_v2 = vld [vmem:[#allocation2] ss:$8 sps:$4 sm:$0xff]   ;;  %178 = vmatprep.subr.bf16.mxu0 %v742_v1  ;;  %v745_v3 = vld [vmem:[#allocation2 + $0x14] ss:$8 sps:$4 sm:$0xff]   ;;  %v747_v4 = vld [vmem:[#allocation2 + $0x10] ss:$8 sps:$4 sm:$0xff]  }
  0x38   :  { %179 = vmatpush1.bf16.msra.mxu0 %v744_v2  ;;  %v748_v5 = vld [vmem:[#allocation2 + $0x24] ss:$8 sps:$4 sm:$0xff]   ;;  %v750_v6 = vld [vmem:[#allocation2 + $0x20] ss:$8 sps:$4 sm:$0xff]   ;;  %v751_v7 = vld [vmem:[#allocation2 + $0x34] ss:$8 sps:$4 sm:$0xff]  }
  0x39   :  { %180 = vmatprep.subr.bf16.mxu0 %v745_v3  ;;  %v753_v8 = vld [vmem:[#allocation2 + $0x30] ss:$8 sps:$4 sm:$0xff]   ;;  %v754_v9 = vld [vmem:[#allocation2 + $0x44] ss:$8 sps:$4 sm:$0xff]   ;;  %v768_v11 = vld [vmem:[#allocation4] ss:$8 sps:$4 sm:$0xff]  }
  0x3a   :  { %v766_v10 = vld [vmem:[#allocation4 + $0x4] ss:$8 sps:$4 sm:$0xff]   ;;  %v769_v12 = vld [vmem:[#allocation4 + $0x14] ss:$8 sps:$4 sm:$0xff]   ;;  %v756_v13 = vld [vmem:[#allocation2 + $0x40] ss:$8 sps:$4 sm:$0xff]  }
  0x3b   :  { %427 = vmatprep.subr.bf16.mxu1 %v766_v10  ;;  %v771_v14 = vld [vmem:[#allocation4 + $0x10] ss:$8 sps:$4 sm:$0xff]   ;;  %v772_v15 = vld [vmem:[#allocation4 + $0x24] ss:$8 sps:$4 sm:$0xff]   ;;  %v757_v16 = vld [vmem:[#allocation2 + $0x54] ss:$8 sps:$4 sm:$0xff]  }
  0x3c   :  { %181 = vmatpush1.bf16.msra.mxu0 %v747_v4  ;;  %428 = vmatpush1.bf16.msra.mxu1 %v768_v11  ;;  %v759_v17 = vld [vmem:[#allocation2 + $0x50] ss:$8 sps:$4 sm:$0xff]   ;;  %v774_v18 = vld [vmem:[#allocation4 + $0x20] ss:$8 sps:$4 sm:$0xff]   ;;  %v775_v19 = vld [vmem:[#allocation4 + $0x34] ss:$8 sps:$4 sm:$0xff]  }
  0x3d   :  { %182 = vmatprep.subr.bf16.mxu0 %v748_v5  ;;  %429 = vmatprep.subr.bf16.mxu1 %v769_v12  ;;  %v760_v20 = vld [vmem:[#allocation2 + $0x64] ss:$8 sps:$4 sm:$0xff]   ;;  %v762_v21 = vld [vmem:[#allocation2 + $0x60] ss:$8 sps:$4 sm:$0xff]   ;;  %v777_v22 = vld [vmem:[#allocation4 + $0x30] ss:$8 sps:$4 sm:$0xff]  }
  0x3e   :  { %v778_v23 = vld [vmem:[#allocation4 + $0x44] ss:$8 sps:$4 sm:$0xff]   ;;  %v763_v24 = vld [vmem:[#allocation2 + $0x74] ss:$8 sps:$4 sm:$0xff]   ;;  %v765_v25 = vld [vmem:[#allocation2 + $0x70] ss:$8 sps:$4 sm:$0xff]  }
  0x3f   :  { %v68_v26 = vld [vmem:[%s1006_s0] sm:$0x1]  ;;  %v781_v28 = vld [vmem:[#allocation4 + $0x54] ss:$8 sps:$4 sm:$0xff]   ;;  %v783_v29 = vld [vmem:[#allocation4 + $0x50] ss:$8 sps:$4 sm:$0xff]  }
  0x40   :  { %183 = vmatpush1.bf16.msra.mxu0 %v750_v6  ;;  %430 = vmatpush1.bf16.msra.mxu1 %v771_v14  ;;  %v780_v27 = vld [vmem:[#allocation4 + $0x40] ss:$8 sps:$4 sm:$0xff]   ;;  %v784_v30 = vld [vmem:[#allocation4 + $0x64] ss:$8 sps:$4 sm:$0xff]   ;;  %v69_v31 = vpack.c.bf16 %v68_v26, %v68_v26  ;;  %v787_v33 = vld [vmem:[#allocation4 + $0x74] ss:$8 sps:$4 sm:$0xff]  }
  0x41   :  { %184 = vmatprep.subr.bf16.mxu0 %v751_v7  ;;  %431 = vmatprep.subr.bf16.mxu1 %v772_v15  ;;  %v786_v32 = vld [vmem:[#allocation4 + $0x60] ss:$8 sps:$4 sm:$0xff]   ;;  %v789_v34 = vld [vmem:[#allocation4 + $0x70] ss:$8 sps:$4 sm:$0xff]   ;;  %v790_v35 = vld [vmem:[#allocation4 + $0x84] ss:$8 sps:$4 sm:$0xff]  }
  0x42   :  { %v792_v36 = vld [vmem:[#allocation4 + $0x80] ss:$8 sps:$4 sm:$0xff]   ;;  %v793_v37 = vld [vmem:[#allocation4 + $0x94] ss:$8 sps:$4 sm:$0xff]   ;;  %v795_v38 = vld [vmem:[#allocation4 + $0x90] ss:$8 sps:$4 sm:$0xff]  }
  0x43   :  { %v796_v39 = vld [vmem:[#allocation4 + $0xa4] ss:$8 sps:$4 sm:$0xff]   ;;  %v798_v40 = vld [vmem:[#allocation4 + $0xa0] ss:$8 sps:$4 sm:$0xff]   ;;  %v799_v41 = vld [vmem:[#allocation4 + $0xb4] ss:$8 sps:$4 sm:$0xff]  }
  0x44   :  { %185 = vmatpush1.bf16.msra.mxu0 %v753_v8  ;;  %432 = vmatpush1.bf16.msra.mxu1 %v774_v18  ;;  %v801_v42 = vld [vmem:[#allocation4 + $0xb0] ss:$8 sps:$4 sm:$0xff]   ;;  %v802_v43 = vld [vmem:[#allocation4 + $0xc4] ss:$8 sps:$4 sm:$0xff]   ;;  %v804_v44 = vld [vmem:[#allocation4 + $0xc0] ss:$8 sps:$4 sm:$0xff]  }
  0x45   :  { %186 = vmatprep.subr.bf16.mxu0 %v754_v9  ;;  %433 = vmatprep.subr.bf16.mxu1 %v775_v19  ;;  %v805_v45 = vld [vmem:[#allocation4 + $0xd4] ss:$8 sps:$4 sm:$0xff]   ;;  %v807_v46 = vld [vmem:[#allocation4 + $0xd0] ss:$8 sps:$4 sm:$0xff]   ;;  %v808_v47 = vld [vmem:[#allocation4 + $0xe4] ss:$8 sps:$4 sm:$0xff]  }
  0x46   :  { %v810_v48 = vld [vmem:[#allocation4 + $0xe0] ss:$8 sps:$4 sm:$0xff]   ;;  %v811_v49 = vld [vmem:[#allocation4 + $0xf4] ss:$8 sps:$4 sm:$0xff]   ;;  %v813_v50 = vld [vmem:[#allocation4 + $0xf0] ss:$8 sps:$4 sm:$0xff]  }
  0x47   :  { %v814_v51 = vld [vmem:[#allocation6 + $0x40] sm:$0xff]   ;;  %v816_v53 = vld [vmem:[#allocation6 + $0x48] sm:$0xff]   ;;  %v819_v56 = vld [vmem:[#allocation6 + $0x10] sm:$0xff]   ;;  %v169_v0 = vshrl.u32 %v168_v63, 7 }
  0x48   :  { %187 = vmatpush1.bf16.msra.mxu0 %v756_v13  ;;  %434 = vmatpush1.bf16.msra.mxu1 %v777_v22  ;;  %v815_v52 = vld [vmem:[#allocation6] sm:$0xff]   ;;  %v817_v54 = vld [vmem:[#allocation6 + $0x8] sm:$0xff]   ;;  %v820_v57 = vld [vmem:[#allocation6 + $0x58] sm:$0xff]  }
  0x49   :  { %188 = vmatprep.subr.bf16.mxu0 %v757_v16  ;;  %435 = vmatprep.subr.bf16.mxu1 %v778_v23  ;;  %v821_v58 = vld [vmem:[#allocation6 + $0x18] sm:$0xff]   ;;  %v822_v59 = vld [vmem:[#allocation6 + $0x60] sm:$0xff]   ;;  %v824_v61 = vld [vmem:[#allocation6 + $0x68] sm:$0xff]   ;;  %v170_v1 = vsub.s32 0, %v169_v0  ;;  %v174_v3 = vsub.s32 1, %v169_v0 }
  0x4a   :  { %v823_v60 = vld [vmem:[#allocation6 + $0x20] sm:$0xff]   ;;  %v825_v62 = vld [vmem:[#allocation6 + $0x28] sm:$0xff]   ;;  %v826_v16 = vld [vmem:[#allocation6 + $0x70] sm:$0xff]  }
  0x4b   :  { %v86_v2 = vld [vmem:[%s1008_s2] sm:$0x3]  ;;  %v828_v18 = vld [vmem:[#allocation6 + $0x78] sm:$0xff]  }
  0x4c   :  { %189 = vmatpush1.bf16.msra.mxu0 %v759_v17  ;;  %436 = vmatpush1.bf16.msra.mxu1 %v780_v27  ;;  %v171_v4 = vrot.slane %v86_v2, %v170_v1  ;;  %v175_v5 = vrot.slane %v86_v2, %v174_v3  ;;  %v827_v17 = vld [vmem:[#allocation6 + $0x30] sm:$0xff]   ;;  %v829_v19 = vld [vmem:[#allocation6 + $0x38] sm:$0xff]  }
  0x4d   :  { %190 = vmatprep.subr.bf16.mxu0 %v760_v20  ;;  %437 = vmatprep.subr.bf16.mxu1 %v781_v28  ;;  %v255_v20 = vld [vmem:[%s1010_s4] sm:$0x3] }
  0x4e   :  { %v424_v22 = vrot.slane %v255_v20, %v174_v3 }
  0x50   :  { %191 = vmatpush1.bf16.msra.mxu0 %v762_v21  ;;  %438 = vmatpush1.bf16.msra.mxu1 %v783_v29  ;;  %v420_v21 = vrot.slane %v255_v20, %v170_v1 }
  0x51   :  { %192 = vmatprep.subr.bf16.mxu0 %v763_v24  ;;  %439 = vmatprep.subr.bf16.mxu1 %v784_v30 }
  0x54   :  { %193 = vmatpush1.bf16.msra.mxu0 %v765_v25  ;;  %440 = vmatpush1.bf16.msra.mxu1 %v786_v32 }
  0x55   :  { %441 = vmatprep.subr.bf16.mxu1 %v787_v33  ;;  %712 = vmatprep.subr.bf16.mxu0 %v814_v51 }
  0x57   :  { %211 = vmatmul.mubr.bf16.vlgmr.msra.gmra.mrb[0].mxu0 %v69_v31 }
  0x58   :  { %442 = vmatpush1.bf16.msra.mxu1 %v789_v34  ;;  %713 = vmatpush3.bf16.msra.mxu0 %v815_v52  ;;  %v504_v34 = vld [vmem:[%s1012_s6] sm:$0x1] }
  0x59   :  { %443 = vmatprep.subr.bf16.mxu1 %v790_v35  ;;  %714 = vmatprep.subr.bf16.mxu0 %v816_v53 }
  0x5c   :  { %444 = vmatpush1.bf16.msra.mxu1 %v792_v36  ;;  %715 = vmatpush3.bf16.msra.mxu0 %v817_v54 }
  0x5d   :  { %445 = vmatprep.subr.bf16.mxu1 %v793_v37  ;;  %716 = vmatprep.subr.bf16.mxu0 %v818_v55 }
  0x60   :  { %446 = vmatpush1.bf16.msra.mxu1 %v795_v38  ;;  %717 = vmatpush3.bf16.msra.mxu0 %v819_v56 }
  0x61   :  { %447 = vmatprep.subr.bf16.mxu1 %v796_v39  ;;  %718 = vmatprep.subr.bf16.mxu0 %v820_v57 }
  0x64   :  { %448 = vmatpush1.bf16.msra.mxu1 %v798_v40  ;;  %719 = vmatpush3.bf16.msra.mxu0 %v821_v58 }
  0x65   :  { %449 = vmatprep.subr.bf16.mxu1 %v799_v41  ;;  %720 = vmatprep.subr.bf16.mxu0 %v822_v59 }
  0x68   :  { %450 = vmatpush1.bf16.msra.mxu1 %v801_v42  ;;  %721 = vmatpush3.bf16.msra.mxu0 %v823_v60 }
  0x69   :  { %451 = vmatprep.subr.bf16.mxu1 %v802_v43  ;;  %722 = vmatprep.subr.bf16.mxu0 %v824_v61 }
  0x6c   :  { %452 = vmatpush1.bf16.msra.mxu1 %v804_v44  ;;  %723 = vmatpush3.bf16.msra.mxu0 %v825_v62 }
  0x6d   :  { %453 = vmatprep.subr.bf16.mxu1 %v805_v45  ;;  %724 = vmatprep.subr.bf16.mxu0 %v826_v16 }
  0x70   :  { %454 = vmatpush1.bf16.msra.mxu1 %v807_v46  ;;  %725 = vmatpush3.bf16.msra.mxu0 %v827_v17 }
  0x71   :  { %455 = vmatprep.subr.bf16.mxu1 %v808_v47  ;;  %726 = vmatprep.subr.bf16.mxu0 %v828_v18 }
  0x74   :  { %456 = vmatpush1.bf16.msra.mxu1 %v810_v48  ;;  %727 = vmatpush3.bf16.msra.mxu0 %v829_v19 }
  0x75   :  { %457 = vmatprep.subr.bf16.mxu1 %v811_v49 }
  0x78   :  { %458 = vmatpush1.bf16.msra.mxu1 %v813_v50 }
 0x12a   :  { %v212_v6 = vpop.f32.mrb[0].mxu0 }
 0x12b   :  { %v213_v7 = vadd.f32 %v212_v6, %v171_v4  ;;  %v214_v8 = vpop.f32.mrb[1].mxu0 }
 0x12c   :  { %v215_v9 = vadd.f32 %v214_v8, %v175_v5  ;;  %v216_v10 = vpop.f32.mrb[2].mxu0 }
 0x12d   :  { %v219_v11 = vmax.f32 %v213_v7, 0.0  ;;  %v217_v12 = vpop.f32.mrb[3].mxu0 }
 0x12e   :  { %v220_v13 = vmax.f32 %v215_v9, 0.0 }
 0x12f   :  { %v221_v15 = vpack.c.bf16 %v219_v11, %v219_v11 }
 0x130   :  { %v222_v14 = vpack.c.bf16 %v220_v13, %v220_v13 }
 0x132   :  { %459 = vmatprep.mubr.bf16.mxu1 %v222_v14 }
 0x133   :  { %460 = vmatmul.mubr.bf16.vlgmr.msra.gmra.mrb[0].mxu1 %v221_v15 }
 0x206   :  { %v461_v23 = vpop.f32.mrb[0].mxu1 }
 0x207   :  { %v462_v24 = vadd.f32 %v461_v23, %v420_v21  ;;  %v463_v25 = vpop.f32.mrb[1].mxu1 }
 0x208   :  { %v464_v26 = vadd.f32 %v463_v25, %v424_v22  ;;  %v465_v27 = vpop.f32.mrb[2].mxu1 }
 0x209   :  { %v468_v28 = vmax.f32 %v462_v24, 0.0  ;;  %v466_v29 = vpop.f32.mrb[3].mxu1 }
 0x20a   :  { %v469_v30 = vmax.f32 %v464_v26, 0.0 }
 0x20b   :  { %v470_v32 = vpack.c.bf16 %v468_v28, %v468_v28 }
 0x20c   :  { %v471_v31 = vpack.c.bf16 %v469_v30, %v469_v30 }
 0x20e   :  { %633 = vmatprep.mubr.bf16.mxu0 %v471_v31 }
 0x20f   :  { %634 = vmatmul.mubr.bf16.vlgmr.msra.gmra.mrb[4].mxu0 %v470_v32 }
 0x2e2   :  { %v728_v33 = vpop.f32.mrb[4].mxu0 }
 0x2e3   :  { %v729_v35 = vpop.f32.mrb[5].mxu0 }
 0x2e4   :  { %v730_v36 = vadd.f32 %v729_v35, %v728_v33  ;;  %v731_v37 = vpop.f32.mrb[6].mxu0 }
 0x2e5   :  { %v732_v38 = vpop.f32.mrb[7].mxu0 }
 0x2e6   :  { %v636_v39 = vadd.f32 %v730_v36, %v504_v34 }
 0x2e8   :  { %641 = vst [vmem:[%s1013_s7] sm:$0x1] %v636_v39 }
 0x2e9   :  { %646 = vsyncpa [#allocation3], 1 }
 0x2ea   :  { %647 = vsyncpa [#allocation5], 1 }

</bundles_post_ra>
